<compile_context>
chip_gen: v7x
topology: tpu7x:2x2x1
jax: 0.10.0
libtpu: 0.0.40
codegen_flags: <defaults>
</compile_context>

<pallas_src>
import math

import jax
import jax.numpy as jnp
from jax.experimental import pallas as pl
from jax.experimental.pallas import tpu as pltpu


# ----------------------------- in-kernel helpers -----------------------------

def _layer_norm(x, g, b, eps=1e-6):
    # torchvision Encoder uses partial(nn.LayerNorm, eps=1e-6): biased variance
    # over last dim, eps inside sqrt.
    mean = jnp.mean(x, axis=-1, keepdims=True)
    var = jnp.mean(jnp.square(x - mean), axis=-1, keepdims=True)
    return (x - mean) * jax.lax.rsqrt(var + eps) * g + b


def _gelu_exact(x):
    # nn.GELU() default = exact erf formulation (kept exact to match semantics;
    # tanh approximation would halve EUP work if tolerance allowed).
    return 0.5 * x * (1.0 + jax.lax.erf(x * (1.0 / math.sqrt(2.0))))


def _bf16(x):
    return x.astype(jnp.bfloat16)


# ------------------------------ Pallas kernels --------------------------------

def make_block_kernel(num_heads, add_pos, final_ln, bt, seq, dim):
    """Build one fused EncoderBlock kernel for a (bt, seq, dim) input block.

    Optional fusions (selected statically): pos-embedding add prologue for the
    first layer, final LayerNorm epilogue for the last layer.
    """
    H, S, D = num_heads, seq, dim
    assert D % H == 0
    hd = D // H

    def kernel(*refs):
        it = iter(refs)
        x_ref = next(it)
        pos_ref = next(it) if add_pos else None
        (ln1_g, ln1_b, win, b_in, wout, bout,
         ln2_g, ln2_b, w1, b1, w2, b2) = [next(it) for _ in range(12)]
        if final_ln:
            lnf_g = next(it)
            lnf_b = next(it)
        o_ref = next(it)

        x = x_ref[...]                               # (Bt, S, D) fp32 residual
        if add_pos:
            x = x + pos_ref[...]                     # (1, S, D) broadcasts
        xf = x.reshape(bt * S, D)                    # flatten rows for dense matmuls

        # ---- LN1 + fused QKV projection (softmax scale folded into W_q/b_q) ----
        xn = _layer_norm(xf, ln1_g[...], ln1_b[...])
        qkv = jnp.dot(_bf16(xn), win[...],
                      preferred_element_type=jnp.float32) + b_in[...]   # (Bt*S, 3D)
        qkvb = _bf16(qkv)

        # ---- head-major (Bt*H, S, hd) via static slices + leading-dim stack ----
        def heads(base):
            return jnp.stack(
                [qkvb[b * S:(b + 1) * S, base + h * hd: base + (h + 1) * hd]
                 for b in range(bt) for h in range(H)], axis=0)

        qh = heads(0)            # (N, S, hd), N = Bt*H
        kh = heads(D)
        vh = heads(2 * D)

        # ---- one batched attention over all (image, head) pairs ----
        s = jnp.einsum('nqd,nkd->nqk', qh, kh,
                       preferred_element_type=jnp.float32)              # (N, S, S)
        s = s - jnp.max(s, axis=-1, keepdims=True)
        p = jnp.exp(s)
        p = p * pl.reciprocal(jnp.sum(p, axis=-1, keepdims=True), approx=True)
        pv = jnp.einsum('nqk,nkd->nqd', _bf16(p), vh,
                        preferred_element_type=jnp.float32)             # (N, S, hd)

        # ---- lane-dense (Bt*S, D) context, fed straight into out-projection ----
        ctx = jnp.concatenate(
            [jnp.concatenate([pv[b * H + h] for h in range(H)], axis=-1)
             for b in range(bt)], axis=0)                               # (Bt*S, D)

        attn = jnp.dot(_bf16(ctx), wout[...],
                       preferred_element_type=jnp.float32) + bout[...]

        # residual 1 (dropout == identity in eval)
        x1 = xf + attn

        # ---- LN2 + MLP ----
        y = _layer_norm(x1, ln2_g[...], ln2_b[...])
        h1 = _gelu_exact(jnp.dot(_bf16(y), w1[...],
                                 preferred_element_type=jnp.float32) + b1[...])
        h2 = jnp.dot(_bf16(h1), w2[...],
                     preferred_element_type=jnp.float32) + b2[...]

        out = x1 + h2
        if final_ln:
            out = _layer_norm(out, lnf_g[...], lnf_b[...])
        o_ref[...] = out.reshape(bt, S, D).astype(o_ref.dtype)

    return kernel


def layernorm_kernel(x_ref, g_ref, b_ref, o_ref):
    # Only used as a fallback when num_layers == 0 (nothing to fuse into).
    o_ref[0] = _layer_norm(x_ref[0], g_ref[...], b_ref[...]).astype(o_ref.dtype)


# ------------------------------ host-side wrappers ----------------------------

_WEIGHT_ORDER = ("ln1_g", "ln1_b", "win", "bin", "wout", "bout",
                 "ln2_g", "ln2_b", "w1", "b1", "w2", "b2")


def _const_spec(a):
    # Same block index every grid step -> weight tile stays resident in VMEM.
    return pl.BlockSpec(a.shape, lambda b, _n=a.ndim: (0,) * _n)


def _pick_batch_block(B, S, row_target=256):
    """Largest divisor Bt of B with Bt*S <= row_target rows per MXU pass, while
    keeping >= 2 grid steps when B >= 2 (both v7x TensorCores get work)."""
    best = 1
    for bt in range(1, B + 1):
        if B % bt:
            continue
        if bt > 1 and bt * S > row_target:
            continue
        if B >= 2 and (B // bt) < 2:
            continue
        best = bt
    return best


def prepare_layer_weights(p, num_heads):
    """Host-side weight plumbing: transpose to (in, out), fold the 1/sqrt(hd)
    attention scale into the q projection, and cast matmul weights to bf16
    (biases / LN params stay fp32; accumulation stays fp32 in-kernel)."""
    D = p["wout"].shape[0]
    hd = D // num_heads
    scale = 1.0 / math.sqrt(hd)
    win_t = p["win"].T                                   # (D, 3D)
    win_t = win_t.at[:, :D].multiply(scale)              # scale W_q
    b_in = p["bin"].at[:, :D].multiply(scale)            # scale b_q
    return dict(
        ln1_g=p["ln1_g"], ln1_b=p["ln1_b"],
        win=win_t.astype(jnp.bfloat16), bin=b_in,
        wout=p["wout"].T.astype(jnp.bfloat16), bout=p["bout"],
        ln2_g=p["ln2_g"], ln2_b=p["ln2_b"],
        w1=p["w1"].T.astype(jnp.bfloat16), b1=p["b1"],
        w2=p["w2"].T.astype(jnp.bfloat16), b2=p["b2"],
    )


def encoder_block(x, prepped, num_heads, *, pos_embedding=None, final_ln=None,
                  batch_block=1):
    B, S, D = x.shape
    Bt = batch_block
    assert B % Bt == 0
    add_pos = pos_embedding is not None
    has_final = final_ln is not None

    inputs = [x]
    in_specs = [pl.BlockSpec((Bt, S, D), lambda b: (b, 0, 0))]
    if add_pos:
        inputs.append(pos_embedding)
        in_specs.append(_const_spec(pos_embedding))
    weights = [prepped[k] for k in _WEIGHT_ORDER]
    inputs += weights
    in_specs += [_const_spec(w) for w in weights]
    if has_final:
        inputs += list(final_ln)
        in_specs += [_const_spec(a) for a in final_ln]

    return pl.pallas_call(
        make_block_kernel(num_heads, add_pos, has_final, Bt, S, D),
        out_shape=jax.ShapeDtypeStruct((B, S, D), x.dtype),
        grid=(B // Bt,),
        in_specs=in_specs,
        out_specs=pl.BlockSpec((Bt, S, D), lambda b: (b, 0, 0)),
        compiler_params=pltpu.CompilerParams(
            dimension_semantics=("parallel",),
            vmem_limit_bytes=48 * 1024 * 1024),
    )(*inputs)


def layer_norm(x, g, b):
    B, S, D = x.shape
    return pl.pallas_call(
        layernorm_kernel,
        out_shape=jax.ShapeDtypeStruct((B, S, D), x.dtype),
        grid=(B,),
        in_specs=[pl.BlockSpec((1, S, D), lambda i: (i, 0, 0)),
                  _const_spec(g), _const_spec(b)],
        out_specs=pl.BlockSpec((1, S, D), lambda i: (i, 0, 0)),
        compiler_params=pltpu.CompilerParams(dimension_semantics=("parallel",)),
    )(x, g, b)


def encoder_forward(x, pos_embedding, layer_params, ln_g, ln_b, num_heads):
    n = len(layer_params)
    if n == 0:  # nothing to fuse into
        return layer_norm(x + pos_embedding, ln_g, ln_b)
    B, S, _ = x.shape
    bt = _pick_batch_block(B, S)
    prepped = [prepare_layer_weights(p, num_heads) for p in layer_params]
    # TODO(synk): overlap layer i+1 weight DMA with layer i compute via a
    # cross-call prefetch (semaphore/VMEM-ref outputs); omitted for simplicity.
    for i, p in enumerate(prepped):
        x = encoder_block(
            x, p, num_heads,
            pos_embedding=pos_embedding if i == 0 else None,
            final_ln=(ln_g, ln_b) if i == n - 1 else None,
            batch_block=bt)
    return x


# ------------------------------ parameter init --------------------------------

def _xavier_uniform(key, shape):
    fan_out, fan_in = shape
    a = math.sqrt(6.0 / (fan_in + fan_out))
    return jax.random.uniform(key, shape, jnp.float32, -a, a)


def init_encoder_params(key, seq_length, num_layers, hidden_dim, mlp_dim):
    D, M = hidden_dim, mlp_dim
    keys = jax.random.split(key, num_layers + 1)
    pos_embedding = 0.02 * jax.random.normal(keys[0], (1, seq_length, D), jnp.float32)
    layers = []
    for i in range(num_layers):
        k = jax.random.split(keys[i + 1], 6)
        layers.append(dict(
            ln1_g=jnp.ones((1, D), jnp.float32),
            ln1_b=jnp.zeros((1, D), jnp.float32),
            win=_xavier_uniform(k[0], (3 * D, D)),
            bin=jnp.zeros((1, 3 * D), jnp.float32),
            wout=_xavier_uniform(k[1], (D, D)),
            bout=jnp.zeros((1, D), jnp.float32),
            ln2_g=jnp.ones((1, D), jnp.float32),
            ln2_b=jnp.zeros((1, D), jnp.float32),
            w1=_xavier_uniform(k[2], (M, D)),
            b1=1e-6 * jax.random.normal(k[3], (1, M), jnp.float32),
            w2=_xavier_uniform(k[4], (D, M)),
            b2=1e-6 * jax.random.normal(k[5], (1, D), jnp.float32),
        ))
    final_ln_g = jnp.ones((1, D), jnp.float32)
    final_ln_b = jnp.zeros((1, D), jnp.float32)
    return pos_embedding, layers, final_ln_g, final_ln_b


# ----------------------------------- main --------------------------------------

if __name__ == "__main__":
    B, S, D = 2, 8, 32          # batch, seq_length, hidden_dim
    num_heads, mlp_dim, num_layers = 4, 64, 2

    root = jax.random.PRNGKey(0)
    k_in, k_par = jax.random.split(root)

    x = jax.random.normal(k_in, (B, S, D), jnp.float32)
    pos_emb, layer_params, ln_g, ln_b = init_encoder_params(
        k_par, S, num_layers, D, mlp_dim)

    out = encoder_forward(x, pos_emb, layer_params, ln_g, ln_b, num_heads)
    out = jax.block_until_ready(out)
    assert out.shape == (B, S, D)
    assert bool(jnp.all(jnp.isfinite(out)))
    print("KERNEL_OK")
</pallas_src>

<mosaic_0001>
module attributes {stable_mosaic.version = 11 : i64} {
  func.func @kernel(%arg0: i32, %arg1: memref<1x8x32xf32, #tpu.memory_space<vmem>>, %arg2: memref<1x8x32xf32, #tpu.memory_space<vmem>>, %arg3: memref<1x32xf32, #tpu.memory_space<vmem>>, %arg4: memref<1x32xf32, #tpu.memory_space<vmem>>, %arg5: memref<32x96xbf16, #tpu.memory_space<vmem>>, %arg6: memref<1x96xf32, #tpu.memory_space<vmem>>, %arg7: memref<32x32xbf16, #tpu.memory_space<vmem>>, %arg8: memref<1x32xf32, #tpu.memory_space<vmem>>, %arg9: memref<1x32xf32, #tpu.memory_space<vmem>>, %arg10: memref<1x32xf32, #tpu.memory_space<vmem>>, %arg11: memref<32x64xbf16, #tpu.memory_space<vmem>>, %arg12: memref<1x64xf32, #tpu.memory_space<vmem>>, %arg13: memref<64x32xbf16, #tpu.memory_space<vmem>>, %arg14: memref<1x32xf32, #tpu.memory_space<vmem>>, %arg15: memref<1x8x32xf32, #tpu.memory_space<vmem>>) attributes {dimension_semantics = [#tpu.dimension_semantics<parallel>], iteration_bounds = array<i64: 2>, scalar_prefetch = 0 : i64, scratch_operands = 0 : i64, tpu.core_type = #tpu.core_type<tc>, window_params = [{transform_indices = @transform_0, window_bounds = array<i64: 1, 8, 32>}, {pipeline_mode = #tpu.pipeline_mode<synchronous>, transform_indices = @transform_1, window_bounds = array<i64: 1, 8, 32>}, {pipeline_mode = #tpu.pipeline_mode<synchronous>, transform_indices = @transform_2, window_bounds = array<i64: 1, 32>}, {pipeline_mode = #tpu.pipeline_mode<synchronous>, transform_indices = @transform_3, window_bounds = array<i64: 1, 32>}, {pipeline_mode = #tpu.pipeline_mode<synchronous>, transform_indices = @transform_4, window_bounds = array<i64: 32, 96>}, {pipeline_mode = #tpu.pipeline_mode<synchronous>, transform_indices = @transform_5, window_bounds = array<i64: 1, 96>}, {pipeline_mode = #tpu.pipeline_mode<synchronous>, transform_indices = @transform_6, window_bounds = array<i64: 32, 32>}, {pipeline_mode = #tpu.pipeline_mode<synchronous>, transform_indices = @transform_7, window_bounds = array<i64: 1, 32>}, {pipeline_mode = #tpu.pipeline_mode<synchronous>, transform_indices = @transform_8, window_bounds = array<i64: 1, 32>}, {pipeline_mode = #tpu.pipeline_mode<synchronous>, transform_indices = @transform_9, window_bounds = array<i64: 1, 32>}, {pipeline_mode = #tpu.pipeline_mode<synchronous>, transform_indices = @transform_10, window_bounds = array<i64: 32, 64>}, {pipeline_mode = #tpu.pipeline_mode<synchronous>, transform_indices = @transform_11, window_bounds = array<i64: 1, 64>}, {pipeline_mode = #tpu.pipeline_mode<synchronous>, transform_indices = @transform_12, window_bounds = array<i64: 64, 32>}, {pipeline_mode = #tpu.pipeline_mode<synchronous>, transform_indices = @transform_13, window_bounds = array<i64: 1, 32>}, {transform_indices = @transform_14, window_bounds = array<i64: 1, 8, 32>}]} {
    %c0 = arith.constant 0 : index
    %c0_0 = arith.constant 0 : index
    %c0_1 = arith.constant 0 : index
    %0 = vector.load %arg1[%c0, %c0_0, %c0_1] : memref<1x8x32xf32, #tpu.memory_space<vmem>>, vector<1x8x32xf32>
    %c0_2 = arith.constant 0 : index
    %c0_3 = arith.constant 0 : index
    %c0_4 = arith.constant 0 : index
    %1 = vector.load %arg2[%c0_2, %c0_3, %c0_4] : memref<1x8x32xf32, #tpu.memory_space<vmem>>, vector<1x8x32xf32>
    %2 = arith.addf %0, %1 : vector<1x8x32xf32>
    %3 = vector.shape_cast %2 : vector<1x8x32xf32> to vector<8x32xf32>
    %c0_5 = arith.constant 0 : index
    %c0_6 = arith.constant 0 : index
    %4 = vector.load %arg3[%c0_5, %c0_6] : memref<1x32xf32, #tpu.memory_space<vmem>>, vector<1x32xf32>
    %c0_7 = arith.constant 0 : index
    %c0_8 = arith.constant 0 : index
    %5 = vector.load %arg4[%c0_7, %c0_8] : memref<1x32xf32, #tpu.memory_space<vmem>>, vector<1x32xf32>
    %cst = arith.constant dense<0.000000e+00> : vector<8xf32>
    %6 = vector.multi_reduction <add>, %3, %cst [1] : vector<8x32xf32> to vector<8xf32>
    %7 = vector.shape_cast %6 : vector<8xf32> to vector<8x1xf32>
    %cst_9 = arith.constant 3.200000e+01 : f32
    %8 = vector.broadcast %cst_9 : f32 to vector<8x1xf32>
    %9 = arith.divf %7, %8 : vector<8x1xf32>
    %10 = vector.broadcast %9 : vector<8x1xf32> to vector<8x32xf32>
    %11 = arith.subf %3, %10 : vector<8x32xf32>
    %12 = arith.mulf %11, %11 : vector<8x32xf32>
    %cst_10 = arith.constant dense<0.000000e+00> : vector<8xf32>
    %13 = vector.multi_reduction <add>, %12, %cst_10 [1] : vector<8x32xf32> to vector<8xf32>
    %14 = vector.shape_cast %13 : vector<8xf32> to vector<8x1xf32>
    %cst_11 = arith.constant 3.200000e+01 : f32
    %15 = vector.broadcast %cst_11 : f32 to vector<8x1xf32>
    %16 = arith.divf %14, %15 : vector<8x1xf32>
    %17 = vector.broadcast %9 : vector<8x1xf32> to vector<8x32xf32>
    %18 = arith.subf %3, %17 : vector<8x32xf32>
    %cst_12 = arith.constant 9.99999997E-7 : f32
    %19 = vector.broadcast %cst_12 : f32 to vector<8x1xf32>
    %20 = arith.addf %16, %19 : vector<8x1xf32>
    %21 = math.rsqrt %20 : vector<8x1xf32>
    %22 = vector.broadcast %21 : vector<8x1xf32> to vector<8x32xf32>
    %23 = arith.mulf %18, %22 : vector<8x32xf32>
    %24 = vector.broadcast %4 : vector<1x32xf32> to vector<8x32xf32>
    %25 = arith.mulf %23, %24 : vector<8x32xf32>
    %26 = vector.broadcast %5 : vector<1x32xf32> to vector<8x32xf32>
    %27 = arith.addf %25, %26 : vector<8x32xf32>
    %28 = arith.truncf %27 : vector<8x32xf32> to vector<8x32xbf16>
    %c0_13 = arith.constant 0 : index
    %c0_14 = arith.constant 0 : index
    %29 = vector.load %arg5[%c0_13, %c0_14] : memref<32x96xbf16, #tpu.memory_space<vmem>>, vector<32x96xbf16>
    %cst_15 = arith.constant dense<0.000000e+00> : vector<8x96xf32>
    %30 = tpu.matmul %28, %29, %cst_15 {dimension_numbers = #tpu.dot_dimension_numbers<[1], [0], [0], [1], [0, 0, 1, 1], [], []>} : vector<8x32xbf16>, vector<32x96xbf16>, vector<8x96xf32> -> vector<8x96xf32>
    %c0_16 = arith.constant 0 : index
    %c0_17 = arith.constant 0 : index
    %31 = vector.load %arg6[%c0_16, %c0_17] : memref<1x96xf32, #tpu.memory_space<vmem>>, vector<1x96xf32>
    %32 = vector.broadcast %31 : vector<1x96xf32> to vector<8x96xf32>
    %33 = arith.addf %30, %32 : vector<8x96xf32>
    %34 = arith.truncf %33 : vector<8x96xf32> to vector<8x96xbf16>
    %35 = vector.extract_strided_slice %34 {offsets = [0, 0], sizes = [8, 8], strides = [1, 1]} : vector<8x96xbf16> to vector<8x8xbf16>
    %36 = vector.extract_strided_slice %34 {offsets = [0, 8], sizes = [8, 8], strides = [1, 1]} : vector<8x96xbf16> to vector<8x8xbf16>
    %37 = vector.extract_strided_slice %34 {offsets = [0, 16], sizes = [8, 8], strides = [1, 1]} : vector<8x96xbf16> to vector<8x8xbf16>
    %38 = vector.extract_strided_slice %34 {offsets = [0, 24], sizes = [8, 8], strides = [1, 1]} : vector<8x96xbf16> to vector<8x8xbf16>
    %39 = vector.shape_cast %35 : vector<8x8xbf16> to vector<1x8x8xbf16>
    %40 = vector.shape_cast %36 : vector<8x8xbf16> to vector<1x8x8xbf16>
    %41 = vector.shape_cast %37 : vector<8x8xbf16> to vector<1x8x8xbf16>
    %42 = vector.shape_cast %38 : vector<8x8xbf16> to vector<1x8x8xbf16>
    %43 = tpu.concatenate %39, %40, %41, %42 in 0 : vector<1x8x8xbf16>, vector<1x8x8xbf16>, vector<1x8x8xbf16>, vector<1x8x8xbf16> -> vector<4x8x8xbf16>
    %44 = vector.extract_strided_slice %34 {offsets = [0, 32], sizes = [8, 8], strides = [1, 1]} : vector<8x96xbf16> to vector<8x8xbf16>
    %45 = vector.extract_strided_slice %34 {offsets = [0, 40], sizes = [8, 8], strides = [1, 1]} : vector<8x96xbf16> to vector<8x8xbf16>
    %46 = vector.extract_strided_slice %34 {offsets = [0, 48], sizes = [8, 8], strides = [1, 1]} : vector<8x96xbf16> to vector<8x8xbf16>
    %47 = vector.extract_strided_slice %34 {offsets = [0, 56], sizes = [8, 8], strides = [1, 1]} : vector<8x96xbf16> to vector<8x8xbf16>
    %48 = vector.shape_cast %44 : vector<8x8xbf16> to vector<1x8x8xbf16>
    %49 = vector.shape_cast %45 : vector<8x8xbf16> to vector<1x8x8xbf16>
    %50 = vector.shape_cast %46 : vector<8x8xbf16> to vector<1x8x8xbf16>
    %51 = vector.shape_cast %47 : vector<8x8xbf16> to vector<1x8x8xbf16>
    %52 = tpu.concatenate %48, %49, %50, %51 in 0 : vector<1x8x8xbf16>, vector<1x8x8xbf16>, vector<1x8x8xbf16>, vector<1x8x8xbf16> -> vector<4x8x8xbf16>
    %53 = vector.extract_strided_slice %34 {offsets = [0, 64], sizes = [8, 8], strides = [1, 1]} : vector<8x96xbf16> to vector<8x8xbf16>
    %54 = vector.extract_strided_slice %34 {offsets = [0, 72], sizes = [8, 8], strides = [1, 1]} : vector<8x96xbf16> to vector<8x8xbf16>
    %55 = vector.extract_strided_slice %34 {offsets = [0, 80], sizes = [8, 8], strides = [1, 1]} : vector<8x96xbf16> to vector<8x8xbf16>
    %56 = vector.extract_strided_slice %34 {offsets = [0, 88], sizes = [8, 8], strides = [1, 1]} : vector<8x96xbf16> to vector<8x8xbf16>
    %57 = vector.shape_cast %53 : vector<8x8xbf16> to vector<1x8x8xbf16>
    %58 = vector.shape_cast %54 : vector<8x8xbf16> to vector<1x8x8xbf16>
    %59 = vector.shape_cast %55 : vector<8x8xbf16> to vector<1x8x8xbf16>
    %60 = vector.shape_cast %56 : vector<8x8xbf16> to vector<1x8x8xbf16>
    %61 = tpu.concatenate %57, %58, %59, %60 in 0 : vector<1x8x8xbf16>, vector<1x8x8xbf16>, vector<1x8x8xbf16>, vector<1x8x8xbf16> -> vector<4x8x8xbf16>
    "tpu.trace_start"() <{level = 10 : i32, message = "nqd,nkd->nqk"}> : () -> ()
    %cst_18 = arith.constant dense<0.000000e+00> : vector<4x8x8xf32>
    %62 = tpu.matmul %43, %52, %cst_18 {dimension_numbers = #tpu.dot_dimension_numbers<[2], [2], [1], [1], [0, 0, 0, 1, 1, 1], [0], [0]>} : vector<4x8x8xbf16>, vector<4x8x8xbf16>, vector<4x8x8xf32> -> vector<4x8x8xf32>
    "tpu.trace_stop"() : () -> ()
    %cst_19 = arith.constant dense<0xFF800000> : vector<4x8xf32>
    %63 = vector.multi_reduction <maximumf>, %62, %cst_19 [2] : vector<4x8x8xf32> to vector<4x8xf32>
    %64 = vector.shape_cast %63 : vector<4x8xf32> to vector<4x8x1xf32>
    %65 = vector.broadcast %64 : vector<4x8x1xf32> to vector<4x8x8xf32>
    %66 = arith.subf %62, %65 : vector<4x8x8xf32>
    %67 = math.exp %66 : vector<4x8x8xf32>
    %cst_20 = arith.constant dense<0.000000e+00> : vector<4x8xf32>
    %68 = vector.multi_reduction <add>, %67, %cst_20 [2] : vector<4x8x8xf32> to vector<4x8xf32>
    %69 = vector.shape_cast %68 : vector<4x8xf32> to vector<4x8x1xf32>
    %70 = tpu.reciprocal %69 {approx = true} : vector<4x8x1xf32> -> vector<4x8x1xf32>
    %71 = vector.broadcast %70 : vector<4x8x1xf32> to vector<4x8x8xf32>
    %72 = arith.mulf %67, %71 : vector<4x8x8xf32>
    %73 = arith.truncf %72 : vector<4x8x8xf32> to vector<4x8x8xbf16>
    "tpu.trace_start"() <{level = 10 : i32, message = "nqk,nkd->nqd"}> : () -> ()
    %cst_21 = arith.constant dense<0.000000e+00> : vector<4x8x8xf32>
    %74 = tpu.matmul %73, %61, %cst_21 {dimension_numbers = #tpu.dot_dimension_numbers<[2], [1], [1], [2], [0, 0, 0, 1, 1, 2], [0], [0]>} : vector<4x8x8xbf16>, vector<4x8x8xbf16>, vector<4x8x8xf32> -> vector<4x8x8xf32>
    "tpu.trace_stop"() : () -> ()
    %75 = vector.extract_strided_slice %74 {offsets = [0, 0, 0], sizes = [1, 8, 8], strides = [1, 1, 1]} : vector<4x8x8xf32> to vector<1x8x8xf32>
    %76 = vector.shape_cast %75 : vector<1x8x8xf32> to vector<8x8xf32>
    %77 = vector.extract_strided_slice %74 {offsets = [1, 0, 0], sizes = [1, 8, 8], strides = [1, 1, 1]} : vector<4x8x8xf32> to vector<1x8x8xf32>
    %78 = vector.shape_cast %77 : vector<1x8x8xf32> to vector<8x8xf32>
    %79 = vector.extract_strided_slice %74 {offsets = [2, 0, 0], sizes = [1, 8, 8], strides = [1, 1, 1]} : vector<4x8x8xf32> to vector<1x8x8xf32>
    %80 = vector.shape_cast %79 : vector<1x8x8xf32> to vector<8x8xf32>
    %81 = vector.extract_strided_slice %74 {offsets = [3, 0, 0], sizes = [1, 8, 8], strides = [1, 1, 1]} : vector<4x8x8xf32> to vector<1x8x8xf32>
    %82 = vector.shape_cast %81 : vector<1x8x8xf32> to vector<8x8xf32>
    %83 = tpu.concatenate %76, %78, %80, %82 in 1 : vector<8x8xf32>, vector<8x8xf32>, vector<8x8xf32>, vector<8x8xf32> -> vector<8x32xf32>
    %84 = arith.truncf %83 : vector<8x32xf32> to vector<8x32xbf16>
    %c0_22 = arith.constant 0 : index
    %c0_23 = arith.constant 0 : index
    %85 = vector.load %arg7[%c0_22, %c0_23] : memref<32x32xbf16, #tpu.memory_space<vmem>>, vector<32x32xbf16>
    %cst_24 = arith.constant dense<0.000000e+00> : vector<8x32xf32>
    %86 = tpu.matmul %84, %85, %cst_24 {dimension_numbers = #tpu.dot_dimension_numbers<[1], [0], [0], [1], [0, 0, 1, 1], [], []>} : vector<8x32xbf16>, vector<32x32xbf16>, vector<8x32xf32> -> vector<8x32xf32>
    %c0_25 = arith.constant 0 : index
    %c0_26 = arith.constant 0 : index
    %87 = vector.load %arg8[%c0_25, %c0_26] : memref<1x32xf32, #tpu.memory_space<vmem>>, vector<1x32xf32>
    %88 = vector.broadcast %87 : vector<1x32xf32> to vector<8x32xf32>
    %89 = arith.addf %86, %88 : vector<8x32xf32>
    %90 = arith.addf %3, %89 : vector<8x32xf32>
    %c0_27 = arith.constant 0 : index
    %c0_28 = arith.constant 0 : index
    %91 = vector.load %arg9[%c0_27, %c0_28] : memref<1x32xf32, #tpu.memory_space<vmem>>, vector<1x32xf32>
    %c0_29 = arith.constant 0 : index
    %c0_30 = arith.constant 0 : index
    %92 = vector.load %arg10[%c0_29, %c0_30] : memref<1x32xf32, #tpu.memory_space<vmem>>, vector<1x32xf32>
    %cst_31 = arith.constant dense<0.000000e+00> : vector<8xf32>
    %93 = vector.multi_reduction <add>, %90, %cst_31 [1] : vector<8x32xf32> to vector<8xf32>
    %94 = vector.shape_cast %93 : vector<8xf32> to vector<8x1xf32>
    %cst_32 = arith.constant 3.200000e+01 : f32
    %95 = vector.broadcast %cst_32 : f32 to vector<8x1xf32>
    %96 = arith.divf %94, %95 : vector<8x1xf32>
    %97 = vector.broadcast %96 : vector<8x1xf32> to vector<8x32xf32>
    %98 = arith.subf %90, %97 : vector<8x32xf32>
    %99 = arith.mulf %98, %98 : vector<8x32xf32>
    %cst_33 = arith.constant dense<0.000000e+00> : vector<8xf32>
    %100 = vector.multi_reduction <add>, %99, %cst_33 [1] : vector<8x32xf32> to vector<8xf32>
    %101 = vector.shape_cast %100 : vector<8xf32> to vector<8x1xf32>
    %cst_34 = arith.constant 3.200000e+01 : f32
    %102 = vector.broadcast %cst_34 : f32 to vector<8x1xf32>
    %103 = arith.divf %101, %102 : vector<8x1xf32>
    %104 = vector.broadcast %96 : vector<8x1xf32> to vector<8x32xf32>
    %105 = arith.subf %90, %104 : vector<8x32xf32>
    %cst_35 = arith.constant 9.99999997E-7 : f32
    %106 = vector.broadcast %cst_35 : f32 to vector<8x1xf32>
    %107 = arith.addf %103, %106 : vector<8x1xf32>
    %108 = math.rsqrt %107 : vector<8x1xf32>
    %109 = vector.broadcast %108 : vector<8x1xf32> to vector<8x32xf32>
    %110 = arith.mulf %105, %109 : vector<8x32xf32>
    %111 = vector.broadcast %91 : vector<1x32xf32> to vector<8x32xf32>
    %112 = arith.mulf %110, %111 : vector<8x32xf32>
    %113 = vector.broadcast %92 : vector<1x32xf32> to vector<8x32xf32>
    %114 = arith.addf %112, %113 : vector<8x32xf32>
    %115 = arith.truncf %114 : vector<8x32xf32> to vector<8x32xbf16>
    %c0_36 = arith.constant 0 : index
    %c0_37 = arith.constant 0 : index
    %116 = vector.load %arg11[%c0_36, %c0_37] : memref<32x64xbf16, #tpu.memory_space<vmem>>, vector<32x64xbf16>
    %cst_38 = arith.constant dense<0.000000e+00> : vector<8x64xf32>
    %117 = tpu.matmul %115, %116, %cst_38 {dimension_numbers = #tpu.dot_dimension_numbers<[1], [0], [0], [1], [0, 0, 1, 1], [], []>} : vector<8x32xbf16>, vector<32x64xbf16>, vector<8x64xf32> -> vector<8x64xf32>
    %c0_39 = arith.constant 0 : index
    %c0_40 = arith.constant 0 : index
    %118 = vector.load %arg12[%c0_39, %c0_40] : memref<1x64xf32, #tpu.memory_space<vmem>>, vector<1x64xf32>
    %119 = vector.broadcast %118 : vector<1x64xf32> to vector<8x64xf32>
    %120 = arith.addf %117, %119 : vector<8x64xf32>
    %cst_41 = arith.constant 5.000000e-01 : f32
    %121 = vector.broadcast %cst_41 : f32 to vector<8x64xf32>
    %122 = arith.mulf %121, %120 : vector<8x64xf32>
    %cst_42 = arith.constant 0.707106769 : f32
    %123 = vector.broadcast %cst_42 : f32 to vector<8x64xf32>
    %124 = arith.mulf %120, %123 : vector<8x64xf32>
    %125 = math.erf %124 : vector<8x64xf32>
    %cst_43 = arith.constant 1.000000e+00 : f32
    %126 = vector.broadcast %cst_43 : f32 to vector<8x64xf32>
    %127 = arith.addf %126, %125 : vector<8x64xf32>
    %128 = arith.mulf %122, %127 : vector<8x64xf32>
    %129 = arith.truncf %128 : vector<8x64xf32> to vector<8x64xbf16>
    %c0_44 = arith.constant 0 : index
    %c0_45 = arith.constant 0 : index
    %130 = vector.load %arg13[%c0_44, %c0_45] : memref<64x32xbf16, #tpu.memory_space<vmem>>, vector<64x32xbf16>
    %cst_46 = arith.constant dense<0.000000e+00> : vector<8x32xf32>
    %131 = tpu.matmul %129, %130, %cst_46 {dimension_numbers = #tpu.dot_dimension_numbers<[1], [0], [0], [1], [0, 0, 1, 1], [], []>} : vector<8x64xbf16>, vector<64x32xbf16>, vector<8x32xf32> -> vector<8x32xf32>
    %c0_47 = arith.constant 0 : index
    %c0_48 = arith.constant 0 : index
    %132 = vector.load %arg14[%c0_47, %c0_48] : memref<1x32xf32, #tpu.memory_space<vmem>>, vector<1x32xf32>
    %133 = vector.broadcast %132 : vector<1x32xf32> to vector<8x32xf32>
    %134 = arith.addf %131, %133 : vector<8x32xf32>
    %135 = arith.addf %90, %134 : vector<8x32xf32>
    %136 = vector.shape_cast %135 : vector<8x32xf32> to vector<1x8x32xf32>
    %c0_49 = arith.constant 0 : index
    %c0_50 = arith.constant 0 : index
    %c0_51 = arith.constant 0 : index
    %137 = vector.load %arg15[%c0_49, %c0_50, %c0_51] : memref<1x8x32xf32, #tpu.memory_space<vmem>>, vector<1x8x32xf32>
    tpu.vector_store %arg15[%c0_49, %c0_50, %c0_51], %136 {strides = array<i32>} : memref<1x8x32xf32, #tpu.memory_space<vmem>>, vector<1x8x32xf32>,
    return
  }
  func.func @transform_0(%arg0: i32) -> (i32, i32, i32) {
    %c0_i32 = arith.constant 0 : i32
    %c0_i32_0 = arith.constant 0 : i32
    %c0_i32_1 = arith.constant 0 : i32
    return %arg0, %c0_i32, %c0_i32_0 : i32, i32, i32
  }
  func.func @transform_1(%arg0: i32) -> (i32, i32, i32) {
    %c0_i32 = arith.constant 0 : i32
    %c0_i32_0 = arith.constant 0 : i32
    %c0_i32_1 = arith.constant 0 : i32
    %c0_i32_2 = arith.constant 0 : i32
    return %c0_i32, %c0_i32_0, %c0_i32_1 : i32, i32, i32
  }
  func.func @transform_2(%arg0: i32) -> (i32, i32) {
    %c0_i32 = arith.constant 0 : i32
    %c0_i32_0 = arith.constant 0 : i32
    %c0_i32_1 = arith.constant 0 : i32
    return %c0_i32, %c0_i32_0 : i32, i32
  }
  func.func @transform_3(%arg0: i32) -> (i32, i32) {
    %c0_i32 = arith.constant 0 : i32
    %c0_i32_0 = arith.constant 0 : i32
    %c0_i32_1 = arith.constant 0 : i32
    return %c0_i32, %c0_i32_0 : i32, i32
  }
  func.func @transform_4(%arg0: i32) -> (i32, i32) {
    %c0_i32 = arith.constant 0 : i32
    %c0_i32_0 = arith.constant 0 : i32
    %c0_i32_1 = arith.constant 0 : i32
    return %c0_i32, %c0_i32_0 : i32, i32
  }
  func.func @transform_5(%arg0: i32) -> (i32, i32) {
    %c0_i32 = arith.constant 0 : i32
    %c0_i32_0 = arith.constant 0 : i32
    %c0_i32_1 = arith.constant 0 : i32
    return %c0_i32, %c0_i32_0 : i32, i32
  }
  func.func @transform_6(%arg0: i32) -> (i32, i32) {
    %c0_i32 = arith.constant 0 : i32
    %c0_i32_0 = arith.constant 0 : i32
    %c0_i32_1 = arith.constant 0 : i32
    return %c0_i32, %c0_i32_0 : i32, i32
  }
  func.func @transform_7(%arg0: i32) -> (i32, i32) {
    %c0_i32 = arith.constant 0 : i32
    %c0_i32_0 = arith.constant 0 : i32
    %c0_i32_1 = arith.constant 0 : i32
    return %c0_i32, %c0_i32_0 : i32, i32
  }
  func.func @transform_8(%arg0: i32) -> (i32, i32) {
    %c0_i32 = arith.constant 0 : i32
    %c0_i32_0 = arith.constant 0 : i32
    %c0_i32_1 = arith.constant 0 : i32
    return %c0_i32, %c0_i32_0 : i32, i32
  }
  func.func @transform_9(%arg0: i32) -> (i32, i32) {
    %c0_i32 = arith.constant 0 : i32
    %c0_i32_0 = arith.constant 0 : i32
    %c0_i32_1 = arith.constant 0 : i32
    return %c0_i32, %c0_i32_0 : i32, i32
  }
  func.func @transform_10(%arg0: i32) -> (i32, i32) {
    %c0_i32 = arith.constant 0 : i32
    %c0_i32_0 = arith.constant 0 : i32
    %c0_i32_1 = arith.constant 0 : i32
    return %c0_i32, %c0_i32_0 : i32, i32
  }
  func.func @transform_11(%arg0: i32) -> (i32, i32) {
    %c0_i32 = arith.constant 0 : i32
    %c0_i32_0 = arith.constant 0 : i32
    %c0_i32_1 = arith.constant 0 : i32
    return %c0_i32, %c0_i32_0 : i32, i32
  }
  func.func @transform_12(%arg0: i32) -> (i32, i32) {
    %c0_i32 = arith.constant 0 : i32
    %c0_i32_0 = arith.constant 0 : i32
    %c0_i32_1 = arith.constant 0 : i32
    return %c0_i32, %c0_i32_0 : i32, i32
  }
  func.func @transform_13(%arg0: i32) -> (i32, i32) {
    %c0_i32 = arith.constant 0 : i32
    %c0_i32_0 = arith.constant 0 : i32
    %c0_i32_1 = arith.constant 0 : i32
    return %c0_i32, %c0_i32_0 : i32, i32
  }
  func.func @transform_14(%arg0: i32) -> (i32, i32, i32) {
    %c0_i32 = arith.constant 0 : i32
    %c0_i32_0 = arith.constant 0 : i32
    %c0_i32_1 = arith.constant 0 : i32
    return %arg0, %c0_i32, %c0_i32_0 : i32, i32, i32
  }
}

</mosaic_0001>

<bundles_post_ra>
// kernel: tpu_custom_call.1
= control target key start
LH: loop header
LB: loop body
LE: loop exit
PB: predicated region body
PF: predicated region fallthrough
CT: control target
= control target key end

     0   :  { %s2460_s0 = inlined_call_operand.vmem [shape: f32[2,8,32], index: 0, kind: input, shape index: {}]   ;;  %s2461_s1 = inlined_call_operand.hbm [shape: f32[1,8,32], index: 1, kind: input, shape index: {}]   ;;  %s2462_s2 = inlined_call_operand.vmem [shape: f32[1,32], index: 2, kind: input, shape index: {}]   ;;  %s2463_s3 = inlined_call_operand.vmem [shape: f32[1,32], index: 3, kind: input, shape index: {}]   ;;  %s2464_s4 = inlined_call_operand.vmem [shape: bf16[32,96], index: 4, kind: input, shape index: {}]   ;;  %s2465_s5 = inlined_call_operand.hbm [shape: f32[1,96], index: 5, kind: input, shape index: {}]   ;;  %s2466_s6 = inlined_call_operand.vmem [shape: bf16[32,32], index: 6, kind: input, shape index: {}]   ;;  %s2467_s7 = inlined_call_operand.hbm [shape: f32[1,32], index: 7, kind: input, shape index: {}]   ;;  %s2468_s8 = inlined_call_operand.hbm [shape: f32[1,32], index: 8, kind: input, shape index: {}]   ;;  %s2469_s9 = inlined_call_operand.hbm [shape: f32[1,32], index: 9, kind: input, shape index: {}]   ;;  %s2470_s10 = inlined_call_operand.vmem [shape: bf16[32,64], index: 10, kind: input, shape index: {}]   ;;  %s2471_s11 = inlined_call_operand.vmem [shape: f32[1,64], index: 11, kind: input, shape index: {}]   ;;  %s2472_s12 = inlined_call_operand.vmem [shape: bf16[64,32], index: 12, kind: input, shape index: {}]   ;;  %s2473_s13 = inlined_call_operand.vmem [shape: f32[1,32], index: 13, kind: input, shape index: {}]   ;;  %s2474_s14 = inlined_call_operand.hbm [shape: f32[2,8,32], index: 14, kind: output, shape index: {}]  }
   0x1   :  { %2487 = sst [smem:[#allocation23_spill]] %s2465_s5 }
   0x2   :  { %2488 = sst [smem:[#allocation24_spill]] %s2474_s14 }
   0x3   :  { %19 = vsyncpa [#allocation3], 0 }
   0x4   :  { %20 = vsyncpa [#allocation6], 0 }
   0x5   :  { %21 = vsyncpa [#allocation9], 0 }
   0x6   :  { %22 = vsyncpa [#allocation4], 0 }
   0x7   :  { %24 = vsyncpa [#allocation4 + $0x1], 0  ;;  %s2068_s29 = smov 0   ;;  %s2070_s30 = smov 0  }
   0x8   :  { %s2072_s15 = smov 0   ;;  %s2074_s16 = smov 0  }
   0x9 LB: > { %2489 = sst [smem:[#allocation16_spill]] %s1963_s29  ;;  %s2089_s17 = sadd.s32 4294967295, %s1975_s16   ;;  %s1975_s16 = sphi %s2074_s16, %s2516_s16   ;;  %s1971_s15 = sphi %s2072_s15, %s2518_s15   ;;  %s1967_s30 = sphi %s2070_s30, %s2520_s30   ;;  %s1963_s29 = sphi %s2068_s29, %s2519_s29  }
   0xa   : > { %2490 = sst [smem:[#allocation17_spill]] %s1971_s15  ;;  %s1465_s18 = sadd.s32 4294967294, %s1975_s16  }
   0xb   : > { %2491 = sst [smem:[#allocation18_spill]] %s1975_s16  ;;  %s2093_s19 = sadd.s32 1, %s1975_s16  }
   0xc   : > { %2492 = sst [smem:[#allocation19_spill]] %s2093_s19  ;;  %s336_s20 = sadd.s32 1, %s1971_s15 }
   0xd   : > { %s333_s21 = ssub.s32 %s1975_s16, %s2093_s19  ;;  %p346_p0 = scmp.ne.s32.totalorder %s1971_s15, %s1967_s30 }
   0xe   : > { %p334_p1 = scmp.eq.s32.totalorder %s333_s21, 0  ;;  %p347_p2 = scmp.eq.s32.totalorder %s2089_s17, 1 }
   0xf   : > { %p352_p3 = scmp.ne.s32.totalorder %s1967_s30, %s1963_s29  ;;  %p353_p4 = scmp.eq.s32.totalorder %s1465_s18, 1 }
  0x10   : > { %s2104_s22 = scalar_select %p334_p1, %s1971_s15, %s336_s20  }
  0x11   : > { %p2106_p5 = por %p347_p2, %p346_p0  ;;  %p2110_p6 = por %p353_p4, %p352_p3 }
  0x12   : > { %2493 = sst [smem:[#allocation20_spill]] %s2104_s22  ;;  %p1466_p7 = scmp.ge.s32.totalorder %s1975_s16, 1 }
  0x13   : > { %s2494_s23 = scalar_select %p2106_p5, 1, 0 }
  0x14   : > { %s2496_s24 = scalar_select %p2110_p6, 1, 0 }
  0x15   : > { %2495 = sst [smem:[#allocation21_spill]] %s2494_s23  ;;  %p360_p8 = scmp.lt.s32.totalorder %s1975_s16, 3 }
  0x16   : > { %2497 = sst [smem:[#allocation22_spill]] %s2496_s24  ;;  %p2481_p9 = scmp.eq.s32.totalorder %s2089_s17, 0 }
  0x17   : > { %p2117_p10 = pnand %p1466_p7, %p360_p8  ;;  %s1977_s26 = smov [#allocation5]  }
  0x18   : > { %s393_s27 = sshll.u32 %s1977_s26, 4  ;;  %s1978_s28 = smov [#allocation8]   ;;  %s394_s27 = int_to_ptr.vmem [resolvable:$true] %s393_s27 }
  0x19   : > { %s2498_s25 = scalar_select %p2117_p10, 1, 0 }
  0x1a   : > { %p1651_p11 = pneg %p2117_p10  ;;  %s418_s18 = sshll.u32 %s1978_s28, 4  ;;  %s2129_s18 = int_to_ptr.vmem [resolvable:$true] %s418_s18 }
  0x1b   : > { %s1979_s21 = smov [#allocation2]   ;;  %s2500_s5 = sld [smem:[#allocation23_spill]] }
  0x1c   : > { %p2125_p12 = pnand %p2481_p9, %p1651_p11  ;;  %s373_s22 = sshll.u32 %s1979_s21, 4  ;;  %s2131_s22 = int_to_ptr.vmem [resolvable:$true] %s373_s22 }
  0x1e   : > { %p2141_p0 = pneg %p2125_p12 }
  0x21   : > { %s1761_s26 = scalar_lea.hbm %s2500_s5, 16 }
  0x22   : > { %p1762_p13 = scmp.ne.s32.totalorder %s2500_s5, %s1761_s26  ;;  %p1768_p3 = scmp.lt.u32.totalorder %s1761_s26, %s2500_s5 }
  0x24   : > { %p1764_p1 = pnand %p2141_p0, %p1762_p13 }
  0x26   : > { %p1765_p2 = pneg %p1764_p1 }
  0x28   : > { %p1770_p4 = pnand %p1768_p3, %p1765_p2 }
  0x2a   : > { %1773 = shalt.err (!%p1770_p4)
}
  0x2b   : > { %s1774_s15 = scalar_lea.vmem %s394_s27, 16  ;;  %s1781_s29 = scalar_lea.vmem %s394_s27, 32 }
  0x2c   : > { %p1775_p7 = scmp.ne.s32.totalorder %s394_s27, %s1774_s15  ;;  %p1782_p9 = scmp.lt.s32.totalorder %s394_s27, %s394_s27 }
  0x2d   : > { %p1783_p6 = scmp.lt.s32.totalorder %s1781_s29, %s1774_s15 }
  0x2e   : > { %p1777_p8 = pnand %p1775_p7, %p2141_p0 }
  0x2f   : > { %p1784_p5 = por %p1783_p6, %p1782_p9 }
  0x30   : > { %p1778_p11 = pneg %p1777_p8 }
  0x32   : > { %p1785_p10 = pnand %p1784_p5, %p1778_p11 }
  0x34   : > { %1788 = shalt.err (!%p1785_p10)
}
  0x35   : > { %1657 = dma.hbm_to_vmem [thread:$0]  (!%p2125_p12), %s2500_s5, 16, %s394_s27, [#allocation6]  }
  0x36   : > { %s1789_s21 = scalar_lea.hbm %s2468_s8, 16 }
  0x37   : > { %p1790_p13 = scmp.ne.s32.totalorder %s2468_s8, %s1789_s21  ;;  %p1796_p5 = scmp.lt.u32.totalorder %s1789_s21, %s2468_s8 }
  0x39   : > { %p1792_p1 = pnand %p1790_p13, %p2141_p0 }
  0x3b   : > { %p1793_p6 = pneg %p1792_p1 }
  0x3d   : > { %p1798_p9 = pnand %p1796_p5, %p1793_p6 }
  0x3f   : > { %1801 = shalt.err (!%p1798_p9)
}
  0x40   : > { %s1802_s27 = scalar_lea.vmem %s2129_s18, 16  ;;  %s1809_s14 = scalar_lea.vmem %s2129_s18, 32 }
  0x41   : > { %p1803_p10 = scmp.ne.s32.totalorder %s2129_s18, %s1802_s27  ;;  %p1810_p4 = scmp.lt.s32.totalorder %s2129_s18, %s2129_s18 }
  0x42   : > { %p1811_p7 = scmp.lt.s32.totalorder %s1809_s14, %s1802_s27 }
  0x43   : > { %p1805_p2 = pnand %p1803_p10, %p2141_p0 }
  0x44   : > { %p1812_p8 = por %p1811_p7, %p1810_p4 }
  0x45   : > { %p1806_p3 = pneg %p1805_p2 }
  0x47   : > { %p1813_p11 = pnand %p1812_p8, %p1806_p3 }
  0x49   : > { %1816 = shalt.err (!%p1813_p11)
}
  0x4a   : > { %1663 = dma.hbm_to_vmem [thread:$0]  (!%p2125_p12), %s2468_s8, 16, %s2129_s18, [#allocation9]  }
  0x4b   : > { %s1817_s26 = scalar_lea.hbm %s2461_s1, 128 }
  0x4c   : > { %p1818_p13 = scmp.ne.s32.totalorder %s2461_s1, %s1817_s26  ;;  %p1824_p5 = scmp.lt.u32.totalorder %s1817_s26, %s2461_s1 }
  0x4e   : > { %p1820_p1 = pnand %p1818_p13, %p2141_p0 }
  0x50   : > { %p1821_p6 = pneg %p1820_p1 }
  0x52   : > { %p1826_p9 = pnand %p1824_p5, %p1821_p6 }
  0x54   : > { %1829 = shalt.err (!%p1826_p9)
}
  0x55   : > { %s1830_s18 = scalar_lea.vmem %s2131_s22, 128  ;;  %p1838_p4 = scmp.lt.s32.totalorder %s2131_s22, %s2131_s22 }
  0x56   : > { %p1831_p10 = scmp.ne.s32.totalorder %s2131_s22, %s1830_s18  ;;  %p1839_p7 = scmp.lt.s32.totalorder %s1830_s18, %s1830_s18 }
  0x58   : > { %p1833_p2 = pnand %p1831_p10, %p2141_p0  ;;  %p1840_p8 = por %p1839_p7, %p1838_p4 }
  0x5a   : > { %p1834_p3 = pneg %p1833_p2 }
  0x5c   : > { %p1841_p11 = pnand %p1840_p8, %p1834_p3 }
  0x5e   : > { %1844 = shalt.err (!%p1841_p11)
}
  0x5f   : > { %1654 = dma.hbm_to_vmem [thread:$0]  (!%p2125_p12), %s2461_s1, 128, %s2131_s22, [#allocation3]  }
  0x60   : > { %s1980_s19 = smov [#allocation7]   ;;  %s1981_s16 = smov [#allocation10]  }
  0x61   : > { %s407_s24 = sshll.u32 %s1980_s19, 4  ;;  %s429_s26 = sshll.u32 %s1981_s16, 4  ;;  %s408_s24 = int_to_ptr.vmem [resolvable:$true] %s407_s24  ;;  %s430_s26 = int_to_ptr.vmem [resolvable:$true] %s429_s26 }
  0x62   : > { %s1845_s29 = scalar_lea.hbm %s2467_s7, 16 }
  0x63   : > { %p1846_p13 = scmp.ne.s32.totalorder %s2467_s7, %s1845_s29  ;;  %p1852_p5 = scmp.lt.u32.totalorder %s1845_s29, %s2467_s7 }
  0x65   : > { %p1848_p1 = pnand %p1846_p13, %p2141_p0 }
  0x67   : > { %p1849_p6 = pneg %p1848_p1 }
  0x69   : > { %p1854_p9 = pnand %p1852_p5, %p1849_p6 }
  0x6b   : > { %1857 = shalt.err (!%p1854_p9)
}
  0x6c   : > { %s1858_s22 = scalar_lea.vmem %s408_s24, 16  ;;  %s1865_s23 = scalar_lea.vmem %s408_s24, 32 }
  0x6d   : > { %p1859_p10 = scmp.ne.s32.totalorder %s408_s24, %s1858_s22  ;;  %p1866_p4 = scmp.lt.s32.totalorder %s408_s24, %s408_s24 }
  0x6e   : > { %p1867_p7 = scmp.lt.s32.totalorder %s1865_s23, %s1858_s22 }
  0x6f   : > { %p1861_p2 = pnand %p1859_p10, %p2141_p0 }
  0x70   : > { %p1868_p8 = por %p1867_p7, %p1866_p4 }
  0x71   : > { %p1862_p3 = pneg %p1861_p2 }
  0x73   : > { %p1869_p11 = pnand %p1868_p8, %p1862_p3 }
  0x75   : > { %1872 = shalt.err (!%p1869_p11)
}
  0x76   : > { %1660 = dma.hbm_to_vmem [thread:$0]  (!%p2125_p12), %s2467_s7, 16, %s408_s24, [#allocation6]  }
  0x77   : > { %s1873_s15 = scalar_lea.hbm %s2469_s9, 16 }
  0x78   : > { %p1874_p13 = scmp.ne.s32.totalorder %s2469_s9, %s1873_s15  ;;  %p1880_p5 = scmp.lt.u32.totalorder %s1873_s15, %s2469_s9 }
  0x7a   : > { %p1876_p1 = pnand %p1874_p13, %p2141_p0 }
  0x7c   : > { %p1877_p6 = pneg %p1876_p1 }
  0x7e   : > { %p1882_p9 = pnand %p1880_p5, %p1877_p6 }
  0x80   : > { %1885 = shalt.err (!%p1882_p9)
}
  0x81   : > { %s1886_s22 = scalar_lea.vmem %s430_s26, 16  ;;  %s1893_s24 = scalar_lea.vmem %s430_s26, 32 }
  0x82   : > { %p1887_p10 = scmp.ne.s32.totalorder %s430_s26, %s1886_s22  ;;  %p1894_p4 = scmp.lt.s32.totalorder %s430_s26, %s430_s26 }
  0x83   : > { %p1895_p7 = scmp.lt.s32.totalorder %s1893_s24, %s1886_s22 }
  0x84   : > { %p1889_p2 = pnand %p1887_p10, %p2141_p0 }
  0x85   : > { %p1896_p8 = por %p1895_p7, %p1894_p4 }
  0x86   : > { %p1890_p3 = pneg %p1889_p2 }
  0x88   : > { %p1897_p11 = pnand %p1896_p8, %p1890_p3 }
  0x8a   : > { %1900 = shalt.err (!%p1897_p11)
}
  0x8b   : > { %1666 = dma.hbm_to_vmem [thread:$0]  (!%p2125_p12), %s2469_s9, 16, %s430_s26, [#allocation9]  }
  0x8c   : > { %p2502_p13 = scmp.ne.s32.totalorder %s2498_s25, 0 }
  0x8d   : > { %p2503_p1 = scmp.eq.s32.totalorder (!%p2502_p13), %s2089_s17, 0 }
  0x8e   : > { %461 = sbr.rel (%p2502_p13) target bundleno = 2796 (0xaec), region = 76 }
  0x95   : > { %1946 = dma.done.wait (%p2503_p1), [#allocation3], 128   ;;  %p2504_p0 = pmov %p2503_p1 }
  0x97   : > { %1948 = vsyncadd (%p2504_p0), [#allocation3], 4294967168  ;;  %p2505_p6 = pmov %p2504_p0 }
  0x98   : > { %p2506_p5 = pmov %p2504_p0 }
  0x99   : > { %1950 = dma.done.wait (%p2505_p6), [#allocation6], 32  }
  0x9a   : > { %1952 = vsyncadd (%p2506_p5), [#allocation6], 4294967264  ;;  %p2507_p9 = pmov %p2504_p0 }
  0x9b   : > { %p2508_p12 = pmov %p2504_p0 }
  0x9c   : > { %1954 = dma.done.wait (%p2507_p9), [#allocation9], 32  }
  0x9d   : > { %1956 = vsyncadd (%p2508_p12), [#allocation9], 4294967264  ;;  %p522_p10 = scmp.lt.s32.totalorder %s2089_s17, 1  ;;  %v528_v1 = vld [vmem:[#allocation2] sm:$0xff]  ;;  %vm532_vm0 = vcmask 261120   ;;  %v1982_v10 = vmov 0.0  }
  0x9e   : > { %v1729_v9 = vld [vmem:[%s2464_s4] sm:$0xff]   ;;  %1545 = vmatprep.subr.bf16.mxu0 %v1982_v10  ;;  %vm1983_vm1 = vmmov 0   ;;  %v1730_v11 = vld [vmem:[%s2464_s4 + $0x8] sm:$0xff]   ;;  %1553 = vmatprep.subr.bf16.mxu1 %v1982_v10  ;;  %s1984_s24 = smov 104   ;;  %s1985_s23 = smov 120   ;;  %vm638_vm2 = vcmask 64512  }
  0x9f   : > { %s523_s25 = scalar_select %p522_p10, %s2089_s17, 1  ;;  %1549 = vmatprep.mubr.msk.bf16.mxu0 %vm1983_vm1, %v1982_v10  ;;  %1546 = vmatpush3.bf16.msra.mxu0 %v1729_v9  ;;  %v1481_v16 = vld [vmem:[%s2462_s2] ss:$0 sm:$0xff]  ;;  %v1483_v22 = vld [vmem:[#allocation5] ss:$0 sm:$0xff]  ;;  %vm882_vm3 = vcmask 1043456  }
  0xa0   : > { %1547 = vmatprep.subr.bf16.mxu0 %v1982_v10  ;;  %1555 = vmatprep.mubr.msk.bf16.mxu1 %vm1983_vm1, %v1982_v10  ;;  %v1482_v18 = vld [vmem:[%s2463_s3] ss:$0 sm:$0xff]  ;;  %s1986_s19 = smov 112   ;;  %s1989_s21 = smov 8   ;;  %vm1083_vm4 = vcmask 130048   ;;  %vm1085_vm5 = vcmask 195584  }
  0xa1   : > { %s1480_s20 = sshll.u32 %s523_s25, 3  ;;  %s1987_s25 = smov 96   ;;  %vm1296_vm6 = vcmask 523264  }
  0xa2   : > { %s525_s16 = scalar_lea.vmem %s2460_s0, %s1480_s20  ;;  %s1988_s20 = smov 64  }
  0xa3   : > { %v527_v0 = vld [vmem:[%s525_s16] sm:$0xff]  ;;  %1548 = vmatpush3.bf16.msra.mxu0 %v1730_v11  ;;  %s1990_s15 = smov 16   ;;  %s1991_s29 = smov 24  }
  0xa4   : > { %v2259_v2 = vadd.f32 %v528_v1, %v527_v0  ;;  %1559 = vmatprep.subr.bf16.mxu0 %v1982_v10  ;;  %s2509_s14 = sld [smem:[#allocation21_spill]]  ;;  %s1512_s22 = sshll.u32 %s2089_s17, 7 }
  0xa5   : > { %s1992_s16 = smov [#allocation11]  }
  0xa6   : > { %v533_v3 = vsel %vm532_vm0, %v2259_v2, 0.0  ;;  %s1905_s5 = sshll.u32 %s1992_s16, 4  ;;  %s1906_s5 = int_to_ptr.vmem [resolvable:$false] %s1905_s5 }
  0xa7   : > { %534 = vadd.xlane.f32.xlu0 %v533_v3 }
  0xaa   : > { %p2511_p3 = scmp.ne.s32.totalorder %s2509_s14, 0 }
 0x134   : > { %v535_v4 = vpop.xlane.xlu0 %534 }
 0x135   : > { %v537_v5 = vmul.f32 0.03125, %v535_v4 }
 0x137   : > { %v538_v6 = vsub.f32 %v2259_v2, %v537_v5 }
 0x139   : > { %v539_v7 = vmul.f32 %v538_v6, %v538_v6 }
 0x13b   : > { %v540_v8 = vsel %vm532_vm0, %v539_v7, 0.0 }
 0x13c   : > { %541 = vadd.xlane.f32.xlu0 %v540_v8 }
 0x1c9   : > { %v542_v12 = vpop.xlane.xlu0 %541 }
 0x1ca   : > { %v543_v13 = vmul.f32 0.03125, %v542_v12 }
 0x1cc   : > { %v544_v14 = vadd.f32 1e-06, %v543_v13 }
 0x1ce   : > { %1739 = vrsqrt.f32 %v544_v14 }
 0x1d8   : > { %v1740_v15 = vpop.eup %1739 }
 0x1d9   : > { %v546_v17 = vmul.f32 %v1740_v15, %v538_v6 }
 0x1db   : > { %v553_v19 = vmul.f32 %v1481_v16, %v546_v17 }
 0x1dd   : > { %v560_v20 = vadd.f32 %v1482_v18, %v553_v19 }
 0x1df   : > { %v561_v21 = vpack.c.bf16 %v560_v20, %v560_v20 }
 0x1e1   : > { %1550 = vmatmul.mubr.msk.bf16.vlgmr.msra.gmra.mrb[0].mxu0 %vm532_vm0, %v561_v21 }
 0x1e2   : > { %1561 = vmatprep.mubr.msk.bf16.mxu0 %vm1983_vm1, %v1982_v10 }
 0x2b4   : > { %v622_v23 = vpop.f32.mrb[0].mxu0 }
 0x2b5   : > { %v623_v24 = vadd.f32 %v1483_v22, %v622_v23  ;;  %v1551_v25 = vpop.f32.mrb[1].mxu0 }
 0x2b6   : > { %v625_v26 = vpop.f32.mrb[2].mxu0 }
 0x2b7   : > { %v2288_v27 = vpack.c.bf16 %v623_v24, %v623_v24  ;;  %v1552_v28 = vpop.f32.mrb[3].mxu0 }
 0x2b9   : > { %634 = vrot.lane.b32.xlu0 %v2288_v27, %s1984_s24  ;;  %630 = vrot.lane.b32.xlu1 %v2288_v27, %s1985_s23 }
 0x2bd   : > { %632 = vrot.lane.b32.xlu1 %v2288_v27, %s1986_s19 }
 0x2c1   : > { %636 = vrot.lane.b32.xlu1 %v2288_v27, %s1987_s25 }
 0x32b   : > { %v2294_v29 = vpop.permute.xlu1 %630  ;;  %v2300_v31 = vpop.permute.xlu0 %634 }
 0x32c   : > { %685 = vrot.lane.b32.xlu1 %v2294_v29, %s1987_s25 }
 0x32f   : > { %v2297_v30 = vpop.permute.xlu1 %632 }
 0x330   : > { %733 = vrot.lane.b32.xlu1 %v2297_v30, %s1987_s25 }
 0x333   : > { %v637_v32 = vpop.permute.xlu1 %636 }
 0x334   : > { %781 = vrot.lane.b32.xlu1 %v2300_v31, %s1987_s25  ;;  %v643_v33 = vsel %vm638_vm2, %v637_v32, 0 }
 0x335   : > { %1554 = vmatpush3.bf16.xpose.msra.mxu1 %v643_v33 }
 0x336   : > { %1565 = vmatprep.subr.bf16.mxu1 %v1982_v10 }
 0x33c   : > { %1556 = vmatmul.mubr.msk.bf16.vlgmr.msra.gmra.mrb[0].mxu1 %vm638_vm2, %v2288_v27 }
 0x33d   : > { %1567 = vmatprep.mubr.msk.bf16.mxu1 %vm1983_vm1, %v1982_v10 }
 0x39e   : > { %v686_v34 = vpop.permute.xlu1 %685 }
 0x39f   : > { %v691_v35 = vsel %vm638_vm2, %v686_v34, 0 }
 0x3a0   : > { %1560 = vmatpush3.bf16.xpose.msra.mxu0 %v691_v35 }
 0x3a1   : > { %1571 = vmatprep.subr.bf16.mxu0 %v1982_v10 }
 0x3a2   : > { %v734_v36 = vpop.permute.xlu1 %733 }
 0x3a3   : > { %v739_v37 = vsel %vm638_vm2, %v734_v36, 0 }
 0x3a4   : > { %1566 = vmatpush3.bf16.xpose.msra.mxu1 %v739_v37 }
 0x3a5   : > { %1577 = vmatprep.subr.bf16.mxu1 %v1982_v10 }
 0x3a6   : > { %v782_v38 = vpop.permute.xlu1 %781 }
 0x3a7   : > { %v787_v39 = vsel %vm638_vm2, %v782_v38, 0  ;;  %1562 = vmatmul.mubr.msk.bf16.vlgmr.msra.gmra.mrb[4].mxu0 %vm638_vm2, %v2294_v29 }
 0x3a8   : > { %1572 = vmatpush3.bf16.xpose.msra.mxu0 %v787_v39  ;;  %1573 = vmatprep.mubr.msk.bf16.mxu0 %vm1983_vm1, %v1982_v10 }
 0x3a9   : > { %1583 = vmatprep.subr.bf16.mxu0 %v1982_v10 }
 0x3ab   : > { %1568 = vmatmul.mubr.msk.bf16.vlgmr.msra.gmra.mrb[4].mxu1 %vm638_vm2, %v2297_v30 }
 0x3ac   : > { %1579 = vmatprep.mubr.msk.bf16.mxu1 %vm1983_vm1, %v1982_v10 }
 0x3af   : > { %1574 = vmatmul.mubr.msk.bf16.vlgmr.msra.gmra.mrb[8].mxu0 %vm638_vm2, %v2300_v31 }
 0x3b0   : > { %1585 = vmatprep.mubr.msk.bf16.mxu0 %vm1983_vm1, %v1982_v10 }
 0x40f   : > { %v679_v40 = vpop.f32.mrb[0].mxu1 }
 0x410   : > { %v1557_v41 = vpop.f32.mrb[1].mxu1  ;;  %v829_v42 = vsel %vm638_vm2, %v679_v40, -inf }
 0x411   : > { %830 = vmax.xlane.f32.xlu1 %v829_v42  ;;  %v682_v43 = vpop.f32.mrb[2].mxu1 }
 0x412   : > { %v1558_v44 = vpop.f32.mrb[3].mxu1 }
 0x47a   : > { %v727_v45 = vpop.f32.mrb[4].mxu0 }
 0x47b   : > { %v1563_v46 = vpop.f32.mrb[5].mxu0  ;;  %v832_v47 = vsel %vm638_vm2, %v727_v45, -inf }
 0x47c   : > { %833 = vmax.xlane.f32.xlu0 %v832_v47  ;;  %v730_v48 = vpop.f32.mrb[6].mxu0  ;;  %v1731_v46 = vld [vmem:[%s2466_s6] sm:$0xff]   ;;  %v1732_v47 = vld [vmem:[%s2466_s6 + $0x8] sm:$0xff]  }
 0x47d   : > { %v1564_v49 = vpop.f32.mrb[7].mxu0 }
 0x47e   : > { %v775_v50 = vpop.f32.mrb[4].mxu1 }
 0x47f   : > { %v1569_v51 = vpop.f32.mrb[5].mxu1  ;;  %v835_v52 = vsel %vm638_vm2, %v775_v50, -inf }
 0x480   : > { %836 = vmax.xlane.f32.xlu1 %v835_v52  ;;  %v778_v53 = vpop.f32.mrb[6].mxu1 }
 0x481   : > { %v1570_v54 = vpop.f32.mrb[7].mxu1 }
 0x482   : > { %v823_v55 = vpop.f32.mrb[8].mxu0 }
 0x483   : > { %v1575_v56 = vpop.f32.mrb[9].mxu0  ;;  %v838_v57 = vsel %vm638_vm2, %v823_v55, -inf }
 0x484   : > { %839 = vmax.xlane.f32.xlu0 %v838_v57  ;;  %v826_v58 = vpop.f32.mrb[10].mxu0 }
 0x485   : > { %v1576_v59 = vpop.f32.mrb[11].mxu0 }
 0x491   : > { %877 = vrot.lane.b32.xlu1 %v2288_v27, %s1988_s20 }
 0x49e   : > { %v831_v60 = vpop.xlane.xlu1 %830 }
 0x49f   : > { %v841_v61 = vsub.f32 %v679_v40, %v831_v60 }
 0x4a1   : > { %v845_v62 = vmul.f32 1.442695, %v841_v61 }
 0x4a3   : > { %1741 = vpow2.f32 %v845_v62 }
 0x4ad   : > { %v1742_v63 = vpop.eup %1741 }
 0x4ae   : > { %v853_v0 = vsel %vm638_vm2, %v1742_v63, 0.0 }
 0x4b5   : > { %854 = vadd.xlane.f32.xlu1 %v853_v0 }
 0x509   : > { %v834_v1 = vpop.xlane.xlu0 %833 }
 0x50a   : > { %v842_v3 = vsub.f32 %v727_v45, %v834_v1 }
 0x50c   : > { %v847_v4 = vmul.f32 1.442695, %v842_v3 }
 0x50d   : > { %v837_v5 = vpop.xlane.xlu1 %836 }
 0x50e   : > { %1743 = vpow2.f32 %v847_v4  ;;  %v843_v6 = vsub.f32 %v775_v50, %v837_v5  ;;  %v1495_v4 = vld [vmem:[#allocation7] ss:$0 sm:$0xff] }
 0x510   : > { %v849_v7 = vmul.f32 1.442695, %v843_v6 }
 0x511   : > { %v878_v8 = vpop.permute.xlu1 %877  ;;  %v840_v9 = vpop.xlane.xlu0 %839 }
 0x512   : > { %1745 = vpow2.f32 %v849_v7  ;;  %v884_v11 = vsel %vm882_vm3, %v878_v8, 0  ;;  %v844_v12 = vsub.f32 %v823_v55, %v840_v9 }
 0x513   : > { %1578 = vmatpush3.bf16.msra.mxu1 %v884_v11 }
 0x514   : > { %v851_v13 = vmul.f32 1.442695, %v844_v12  ;;  %1589 = vmatprep.subr.bf16.mxu1 %v1982_v10 }
 0x516   : > { %1747 = vpow2.f32 %v851_v13 }
 0x518   : > { %v1744_v14 = vpop.eup %1743 }
 0x519   : > { %v856_v15 = vsel %vm638_vm2, %v1744_v14, 0.0 }
 0x51a   : > { %857 = vadd.xlane.f32.xlu0 %v856_v15 }
 0x51c   : > { %v1746_v16 = vpop.eup %1745 }
 0x51d   : > { %v859_v17 = vsel %vm638_vm2, %v1746_v16, 0.0 }
 0x51e   : > { %860 = vadd.xlane.f32.xlu1 %v859_v17 }
 0x520   : > { %v1748_v18 = vpop.eup %1747 }
 0x521   : > { %v862_v19 = vsel %vm638_vm2, %v1748_v18, 0.0 }
 0x522   : > { %863 = vadd.xlane.f32.xlu0 %v862_v19 }
 0x52f   : > { %974 = vrot.lane.b32.xlu1 %v2297_v30, %s1988_s20 }
 0x533   : > { %1022 = vrot.lane.b32.xlu1 %v2300_v31, %s1988_s20 }
 0x538   : > { %926 = vrot.lane.b32.xlu0 %v2294_v29, %s1988_s20  ;;  %s2510_s20 = sld [smem:[#allocation24_spill]] }
 0x53e   : > { %s2417_s28 = scalar_lea.hbm %s2510_s20, %s1512_s22 }
 0x542   : > { %v855_v20 = vpop.xlane.xlu1 %854 }
 0x543   : > { %1749 = vrcp.f32 %v855_v20 }
 0x54d   : > { %v1750_v21 = vpop.eup %1749 }
 0x54e   : > { %v869_v22 = vmul.f32 %v1750_v21, %v1742_v63 }
 0x550   : > { %v873_v23 = vpack.c.bf16 %v869_v22, %v869_v22 }
 0x552   : > { %1580 = vmatmul.mubr.msk.bf16.vlgmr.msra.gmra.mrb[8].mxu1 %vm638_vm2, %v873_v23  ;;  %v1499_v23 = vld [vmem:[#allocation8] ss:$0 sm:$0xff] }
 0x553   : > { %1591 = vmatprep.mubr.msk.bf16.mxu1 %vm1983_vm1, %v1982_v10 }
 0x5a7   : > { %v858_v24 = vpop.xlane.xlu0 %857 }
 0x5a8   : > { %1751 = vrcp.f32 %v858_v24 }
 0x5ab   : > { %v861_v25 = vpop.xlane.xlu1 %860 }
 0x5ac   : > { %1753 = vrcp.f32 %v861_v25  ;;  %v1500_v25 = vld [vmem:[#allocation10] ss:$0 sm:$0xff] }
 0x5af   : > { %v975_v26 = vpop.permute.xlu1 %974  ;;  %v864_v27 = vpop.xlane.xlu0 %863 }
 0x5b0   : > { %v980_v28 = vsel %vm882_vm3, %v975_v26, 0  ;;  %1755 = vrcp.f32 %v864_v27 }
 0x5b1   : > { %1590 = vmatpush3.bf16.msra.mxu1 %v980_v28 }
 0x5b2   : > { %v1752_v29 = vpop.eup %1751  ;;  %1601 = vmatprep.subr.bf16.mxu1 %v1982_v10 }
 0x5b3   : > { %v870_v30 = vmul.f32 %v1752_v29, %v1744_v14  ;;  %v927_v31 = vpop.permute.xlu0 %926  ;;  %v1023_v33 = vpop.permute.xlu1 %1022  ;;  %v1735_v29 = vld [vmem:[%s2472_s12] sm:$0xff]  }
 0x5b4   : > { %v932_v32 = vsel %vm882_vm3, %v927_v31, 0  ;;  %v1028_v37 = vsel %vm882_vm3, %v1023_v33, 0  ;;  %v1737_v31 = vld [vmem:[%s2472_s12 + $0x10] sm:$0xff]   ;;  %v1501_v33 = vld [vmem:[%s2471_s11] ss:$0 sm:$0xff] }
 0x5b5   : > { %1584 = vmatpush3.bf16.msra.mxu0 %v932_v32  ;;  %v874_v34 = vpack.c.bf16 %v870_v30, %v870_v30  ;;  %v1736_v30 = vld [vmem:[%s2472_s12 + $0x8] sm:$0xff]   ;;  %v1738_v32 = vld [vmem:[%s2472_s12 + $0x18] sm:$0xff]  }
 0x5b6   : > { %v1754_v35 = vpop.eup %1753  ;;  %1595 = vmatprep.subr.bf16.mxu0 %v1982_v10 }
 0x5b7   : > { %v871_v36 = vmul.f32 %v1754_v35, %v1746_v16 }
 0x5b8   : > { %1586 = vmatmul.mubr.msk.bf16.vlgmr.msra.gmra.mrb[12].mxu0 %vm638_vm2, %v874_v34 }
 0x5b9   : > { %1596 = vmatpush3.bf16.msra.mxu0 %v1028_v37  ;;  %v875_v38 = vpack.c.bf16 %v871_v36, %v871_v36  ;;  %1597 = vmatprep.mubr.msk.bf16.mxu0 %vm1983_vm1, %v1982_v10 }
 0x5ba   : > { %v1756_v39 = vpop.eup %1755  ;;  %1609 = vmatprep.subr.bf16.mxu0 %v1982_v10 }
 0x5bb   : > { %v872_v40 = vmul.f32 %v1756_v39, %v1748_v18  ;;  %1592 = vmatmul.mubr.msk.bf16.vlgmr.msra.gmra.mrb[12].mxu1 %vm638_vm2, %v875_v38  ;;  %v1733_v18 = vld [vmem:[%s2470_s10] sm:$0xff]  }
 0x5bc   : > { %1605 = vmatprep.mubr.msk.bf16.mxu1 %vm1983_vm1, %v1982_v10  ;;  %1602 = vmatpush3.bf16.msra.mxu1 %v1731_v46 }
 0x5bd   : > { %v876_v41 = vpack.c.bf16 %v872_v40, %v872_v40  ;;  %1603 = vmatprep.subr.bf16.mxu1 %v1982_v10 }
 0x5c0   : > { %1598 = vmatmul.mubr.msk.bf16.vlgmr.msra.gmra.mrb[16].mxu0 %vm638_vm2, %v876_v41  ;;  %1604 = vmatpush3.bf16.msra.mxu1 %v1732_v47 }
 0x5c1   : > { %1613 = vmatprep.mubr.msk.bf16.mxu0 %vm1983_vm1, %v1982_v10  ;;  %1617 = vmatprep.subr.bf16.mxu1 %v1982_v10 }
 0x5c2   : > { %1610 = vmatpush3.bf16.msra.mxu0 %v1733_v18 }
 0x5c3   : > { %1611 = vmatprep.subr.bf16.mxu0 %v1982_v10 }
 0x625   : > { %v920_v42 = vpop.f32.mrb[8].mxu1 }
 0x626   : > { %v1581_v43 = vpop.f32.mrb[9].mxu1 }
 0x627   : > { %v923_v44 = vpop.f32.mrb[10].mxu1 }
 0x628   : > { %v1582_v45 = vpop.f32.mrb[11].mxu1  ;;  %v1505_v44 = vld [vmem:[%s2473_s13] ss:$0 sm:$0xff] }
 0x68b   : > { %v968_v48 = vpop.f32.mrb[12].mxu0 }
 0x68c   : > { %1071 = vrot.lane.b32.xlu0 %v968_v48, %s1989_s21  ;;  %v1587_v49 = vpop.f32.mrb[13].mxu0  ;;  %s1907_s21 = scalar_lea.vmem %s1906_s5, 256 }
 0x68d   : > { %v971_v50 = vpop.f32.mrb[14].mxu0 }
 0x68e   : > { %v1588_v51 = vpop.f32.mrb[15].mxu0  ;;  %v1016_v52 = vpop.f32.mrb[12].mxu1 }
 0x68f   : > { %1075 = vrot.lane.b32.xlu1 %v1016_v52, %s1990_s15  ;;  %v1593_v53 = vpop.f32.mrb[13].mxu1  ;;  %s519_s15 = sand.u32 1, %s1967_s30  }
 0x690   : > { %v1019_v54 = vpop.f32.mrb[14].mxu1  ;;  %s1343_s17 = scalar_lea.sflag [#allocation4], %s519_s15 }
 0x691   : > { %v1594_v55 = vpop.f32.mrb[15].mxu1 }
 0x693   : > { %v1064_v56 = vpop.f32.mrb[16].mxu0 }
 0x694   : > { %1079 = vrot.lane.b32.xlu0 %v1064_v56, %s1991_s29  ;;  %v1599_v57 = vpop.f32.mrb[17].mxu0  ;;  %s1479_s29 = sshll.u32 %s519_s15, 3 }
 0x695   : > { %v1067_v58 = vpop.f32.mrb[18].mxu0  ;;  %s521_s24 = scalar_lea.vmem [#allocation11], %s1479_s29 }
 0x696   : > { %v1600_v59 = vpop.f32.mrb[19].mxu0  ;;  %s1356_s23 = sshll.u32 %s521_s24, 4  ;;  %s2419_s23 = int_to_ptr.vmem [resolvable:$true] %s1356_s23 }
 0x697   : > { %s1901_s26 = scalar_lea.vmem %s2419_s23, 128  ;;  %p1908_p8 = scmp.lt.s32.totalorder %s2419_s23, %s1906_s5 }
 0x698   : > { %p1902_p2 = scmp.ne.s32.totalorder %s2419_s23, %s1901_s26  ;;  %p1909_p11 = scmp.lt.s32.totalorder %s1907_s21, %s1901_s26 }
 0x69a   : > { %p1903_p4 = pnand %p1902_p2, %p2511_p3  ;;  %p1910_p13 = por %p1909_p11, %p1908_p8 }
 0x69c   : > { %p1904_p7 = pneg %p1903_p4 }
 0x69e   : > { %p1911_p1 = pnand %p1910_p13, %p1904_p7 }
 0x6fe   : > { %v1072_v60 = vpop.permute.xlu0 %1071 }
 0x6ff   : > { %v1082_v62 = vsel %vm638_vm2, %v920_v42, %v1072_v60 }
 0x701   : > { %v1076_v61 = vpop.permute.xlu1 %1075 }
 0x702   : > { %v1084_v63 = vsel %vm1083_vm4, %v1082_v62, %v1076_v61 }
 0x706   : > { %v1080_v0 = vpop.permute.xlu0 %1079 }
 0x707   : > { %v1086_v1 = vsel %vm1085_vm5, %v1084_v63, %v1080_v0 }
 0x708   : > { %v1087_v3 = vpack.c.bf16 %v1086_v1, %v1086_v1 }
 0x70a   : > { %1606 = vmatmul.mubr.msk.bf16.vlgmr.msra.gmra.mrb[16].mxu1 %vm532_vm0, %v1087_v3 }
 0x70b   : > { %1625 = vmatprep.mubr.msk.bf16.mxu1 %vm1983_vm1, %v1982_v10  ;;  %1618 = vmatpush3.bf16.msra.mxu1 %v1735_v29 }
 0x70c   : > { %1619 = vmatprep.subr.bf16.mxu1 %v1982_v10 }
 0x70f   : > { %1620 = vmatpush3.bf16.msra.mxu1 %v1736_v30 }
 0x710   : > { %1621 = vmatprep.subr.bf16.mxu1 %v1982_v10 }
 0x713   : > { %1622 = vmatpush3.bf16.msra.mxu1 %v1737_v31 }
 0x714   : > { %1623 = vmatprep.subr.bf16.mxu1 %v1982_v10 }
 0x717   : > { %1624 = vmatpush3.bf16.msra.mxu1 %v1738_v32 }
 0x7dd   : > { %v1148_v5 = vpop.f32.mrb[16].mxu1 }
 0x7de   : > { %v1149_v6 = vadd.f32 %v1495_v4, %v1148_v5  ;;  %v1607_v7 = vpop.f32.mrb[17].mxu1 }
 0x7df   : > { %v1151_v8 = vpop.f32.mrb[18].mxu1 }
 0x7e0   : > { %v2376_v9 = vadd.f32 %v1149_v6, %v2259_v2  ;;  %v1608_v11 = vpop.f32.mrb[19].mxu1  ;;  %v1734_v2 = vld [vmem:[%s2470_s10 + $0x8] sm:$0xff]  }
 0x7e1   : > { %1612 = vmatpush3.bf16.msra.mxu0 %v1734_v2 }
 0x7e2   : > { %v1157_v12 = vsel %vm532_vm0, %v2376_v9, 0.0 }
 0x7e3   : > { %1158 = vadd.xlane.f32.xlu1 %v1157_v12 }
 0x870   : > { %v1159_v13 = vpop.xlane.xlu1 %1158 }
 0x871   : > { %v1160_v14 = vmul.f32 0.03125, %v1159_v13 }
 0x873   : > { %v1161_v15 = vsub.f32 %v2376_v9, %v1160_v14 }
 0x875   : > { %v1162_v16 = vmul.f32 %v1161_v15, %v1161_v15 }
 0x877   : > { %v1163_v17 = vsel %vm532_vm0, %v1162_v16, 0.0 }
 0x878   : > { %1164 = vadd.xlane.f32.xlu0 %v1163_v17 }
 0x905   : > { %v1165_v19 = vpop.xlane.xlu0 %1164 }
 0x906   : > { %v1166_v20 = vmul.f32 0.03125, %v1165_v19 }
 0x908   : > { %v1167_v21 = vadd.f32 1e-06, %v1166_v20 }
 0x90a   : > { %1757 = vrsqrt.f32 %v1167_v21 }
 0x914   : > { %v1758_v22 = vpop.eup %1757 }
 0x915   : > { %v1169_v24 = vmul.f32 %v1758_v22, %v1161_v15 }
 0x917   : > { %v1176_v26 = vmul.f32 %v1499_v23, %v1169_v24 }
 0x919   : > { %v1183_v27 = vadd.f32 %v1500_v25, %v1176_v26 }
 0x91b   : > { %v1184_v28 = vpack.c.bf16 %v1183_v27, %v1183_v27 }
 0x91d   : > { %1614 = vmatmul.mubr.msk.bf16.vlgmr.msra.gmra.mrb[20].mxu0 %vm532_vm0, %v1184_v28 }
 0x9f0   : > { %v1245_v34 = vpop.f32.mrb[20].mxu0 }
 0x9f1   : > { %v1246_v35 = vadd.f32 %v1501_v33, %v1245_v34  ;;  %v1615_v36 = vpop.f32.mrb[21].mxu0 }
 0x9f2   : > { %v1248_v37 = vpop.f32.mrb[22].mxu0 }
 0x9f3   : > { %v1252_v38 = vmul.f32 0.70710677, %v1246_v35  ;;  %v1616_v39 = vpop.f32.mrb[23].mxu0  ;;  %v1251_v10 = vmul.f32 0.5, %v1246_v35 }
 0x9f5   : > { %1759 = verf.f32 %v1252_v38 }
 0x9ff   : > { %v1760_v40 = vpop.eup %1759 }
 0xa00   : > { %v1254_v41 = vadd.f32 1.0, %v1760_v40 }
 0xa02   : > { %v1255_v42 = vmul.f32 %v1254_v41, %v1251_v10 }
 0xa04   : > { %v1256_v43 = vpack.c.bf16 %v1255_v42, %v1255_v42 }
 0xa06   : > { %1626 = vmatmul.mubr.msk.bf16.vlgmr.msra.gmra.mrb[20].mxu1 %vm1296_vm6, %v1256_v43 }
 0xad9   : > { %v1334_v45 = vpop.f32.mrb[20].mxu1 }
 0xada   : > { %v1335_v46 = vadd.f32 %v1505_v44, %v1334_v45  ;;  %v1627_v47 = vpop.f32.mrb[21].mxu1 }
 0xadb   : > { %v1337_v48 = vpop.f32.mrb[22].mxu1 }
 0xadc   : > { %v1340_v49 = vadd.f32 %v1335_v46, %v2376_v9  ;;  %v1628_v50 = vpop.f32.mrb[23].mxu1 }
 0xade   : > { %1341 = vst.msk [vmem:[%s521_s24] sm:$0xff] %vm532_vm0, %v1340_v49 }
 0xadf   : > { %1914 = shalt.err (!%p1911_p1)
}
 0xae0   : > { %s1915_s15 = scalar_lea.hbm %s2417_s28, 128  ;;  %s1919_s18 = scalar_lea.hbm %s2510_s20, 256 }
 0xae1   : > { %p1916_p0 = scmp.ne.s32.totalorder %s2417_s28, %s1915_s15  ;;  %p1920_p9 = scmp.lt.u32.totalorder %s2417_s28, %s2510_s20 }
 0xae2   : > { %p1921_p12 = scmp.lt.u32.totalorder %s1919_s18, %s1915_s15  ;;  %p1923_p2 = scmp.lt.u32.totalorder %s1915_s15, %s2417_s28 }
 0xae3   : > { %p1917_p6 = pnand %p1916_p0, %p2511_p3 }
 0xae4   : > { %p1922_p10 = por %p1921_p12, %p1920_p9 }
 0xae5   : > { %p1918_p5 = pneg %p1917_p6 }
 0xae6   : > { %p1924_p4 = por %p1923_p2, %p1922_p10 }
 0xae8   : > { %p1925_p7 = pnand %p1924_p4, %p1918_p5 }
 0xaea   : > { %1928 = shalt.err (!%p1925_p7)
}
 0xaeb   : > { %1649 = dma.vmem_to_hbm [thread:$0]  (%p2511_p3), %s2419_s23, 128, %s2417_s28, %s1343_s17  }
 0xaec PF: > { %s2512_s19 = sld [smem:[#allocation18_spill]]  ;;  %s2513_s25 = sld [smem:[#allocation16_spill]] }
 0xaed   : > { %s2514_s26 = sld [smem:[#allocation22_spill]] }
 0xaf2   : > { %p1681_p8 = scmp.ge.s32.totalorder %s2512_s19, 2  ;;  %s1368_s16 = sand.u32 1, %s2513_s25  }
 0xaf3   : > { %p2515_p11 = scmp.ne.s32.totalorder %s2514_s26, 0  ;;  %s1369_s5 = scalar_lea.sflag [#allocation4], %s1368_s16 }
 0xaf5   : > { %p1668_p13 = pnand %p1681_p8, %p2515_p11 }
 0xaf7   : > { %1958 = dma.done.wait (!%p1668_p13), %s1369_s5, 128  }
 0xaf8   : > { %1960 = vsyncadd (!%p1668_p13), %s1369_s5, 4294967168  ;;  %s2516_s16 = sld [smem:[#allocation19_spill]]  ;;  %s2517_s21 = sld [smem:[#allocation17_spill]] }
 0xaf9   : > { %s2518_s15 = sld [smem:[#allocation20_spill]]  ;;  %s2519_s29 = smov %s1967_s30 }
 0xafe   : > { %p27_p1 = scmp.ge.s32.totalorder %s2516_s16, 4   ;;  %s2520_s30 = smov %s2517_s21 }
 0xb00   :  { %29 = sbr.rel (!%p27_p1) target bundleno = 9 (0x9), region = 132 }
 0xb07   :  { %1374 = vsyncpa [#allocation3], 1 }
 0xb08   :  { %1376 = vsyncpa [#allocation3 + $0x1], 1 }
 0xb09   :  { %1377 = vsyncpa [#allocation6], 1 }
 0xb0a   :  { %1378 = vsyncpa [#allocation9], 1 }
 0xb0b   :  { %1379 = vsyncpa [#allocation4], 1 }
 0xb0c   :  { %1381 = vsyncpa [#allocation4 + $0x1], 1 }

</bundles_post_ra>
